<compile_context>
chip_gen: v7x
topology: tpu7x:2x2x1
jax: 0.10.0
libtpu: 0.0.40
codegen_flags: <defaults>
</compile_context>

<pallas_src>
import functools

import jax
import jax.numpy as jnp
from jax.experimental import pallas as pl
from jax.experimental.pallas import tpu as pltpu


def _pow_val_grad_kernel(x_ref, val_ref, grad_ref, *, n):
    """value = x**n, grad = n * x**(n-1), reusing the shared power."""
    x = x_ref[...]
    p = x ** (n - 1)          # n static int -> repeated VPU multiplies
    val_ref[...] = p * x
    grad_ref[...] = n * p


def _pow_val_kernel(x_ref, val_ref, *, n):
    """value = x**n only (grad=False path: skip the second HBM stream)."""
    val_ref[...] = x_ref[...] ** n


def pow_forward(x, n=3, grad=True, *, lanes=512, max_block_rows=512):
    """Pallas equivalent of Pow(f=I(), n=n)(x, grad=grad).

    Note: for n == 0 the gradient is 0 * x**(-1), which is inf/NaN at x == 0
    in both this kernel and the PyTorch reference (consistent behavior).
    """
    orig_shape = x.shape
    dtype = x.dtype
    total = x.size

    # Flatten to a lane-dense 2D slab: last dim = `lanes` (multiple of 128).
    flat = x.reshape(-1)
    rows = pl.cdiv(total, lanes)
    if rows <= max_block_rows:
        # Single block covering the full (small) array: no (8,128) divisibility
        # constraint since block_shape == array shape.
        block_rows = rows
        padded_rows = rows
    else:
        block_rows = max_block_rows
        padded_rows = pl.cdiv(rows, block_rows) * block_rows
    padded_total = padded_rows * lanes
    if padded_total != total:
        flat = jnp.pad(flat, (0, padded_total - total))
    x2d = flat.reshape(padded_rows, lanes)

    grid = (padded_rows // block_rows,)
    block_spec = pl.BlockSpec((block_rows, lanes), lambda i: (i, 0))

    if grad:
        kernel = functools.partial(_pow_val_grad_kernel, n=n)
        out_shape = (
            jax.ShapeDtypeStruct((padded_rows, lanes), dtype),
            jax.ShapeDtypeStruct((padded_rows, lanes), dtype),
        )
        out_specs = (block_spec, block_spec)
    else:
        kernel = functools.partial(_pow_val_kernel, n=n)
        out_shape = jax.ShapeDtypeStruct((padded_rows, lanes), dtype)
        out_specs = block_spec

    result = pl.pallas_call(
        kernel,
        out_shape=out_shape,
        grid=grid,
        in_specs=[block_spec],
        out_specs=out_specs,
        compiler_params=pltpu.CompilerParams(
            dimension_semantics=("parallel",)
        ),
    )(x2d)

    def _unflatten(a):
        return a.reshape(-1)[:total].reshape(orig_shape)

    if grad:
        val2d, grad2d = result
        return _unflatten(val2d), _unflatten(grad2d)
    return _unflatten(result)


if __name__ == "__main__":
    key = jax.random.PRNGKey(0)

    # --- small NCHW input (single-block path) -------------------------------
    B, C, H, W = 2, 4, 16, 16
    x = jax.random.normal(key, (B, C, H, W), dtype=jnp.float32)
    n = 3

    value, dvalue = pow_forward(x, n=n, grad=True)
    value = jax.block_until_ready(value)
    dvalue = jax.block_until_ready(dvalue)

    ref_val = x ** n
    ref_grad = n * jnp.ones_like(x) * x ** (n - 1)
    assert value.shape == x.shape and dvalue.shape == x.shape
    assert jnp.allclose(value, ref_val, rtol=1e-5, atol=1e-5)
    assert jnp.allclose(dvalue, ref_grad, rtol=1e-5, atol=1e-5)

    # grad=False path (value-only kernel, no grad output emitted)
    value_only = jax.block_until_ready(pow_forward(x, n=n, grad=False))
    assert jnp.allclose(value_only, ref_val, rtol=1e-5, atol=1e-5)

    # --- odd-sized input exercising padding + multi-block tiled path --------
    key2 = jax.random.PRNGKey(1)
    y = jax.random.normal(key2, (2, 3, 100, 100), dtype=jnp.float32)
    v2, g2 = pow_forward(y, n=2, grad=True, max_block_rows=8)
    v2 = jax.block_until_ready(v2)
    g2 = jax.block_until_ready(g2)
    assert jnp.allclose(v2, y ** 2, rtol=1e-5, atol=1e-5)
    assert jnp.allclose(g2, 2 * y, rtol=1e-5, atol=1e-5)

    print("KERNEL_OK")
</pallas_src>

<mosaic_0001>
module attributes {stable_mosaic.version = 11 : i64} {
  func.func @_pow_val_grad_kernel(%arg0: i32, %arg1: memref<4x512xf32, #tpu.memory_space<vmem>>, %arg2: memref<4x512xf32, #tpu.memory_space<vmem>>, %arg3: memref<4x512xf32, #tpu.memory_space<vmem>>) attributes {dimension_semantics = [#tpu.dimension_semantics<parallel>], iteration_bounds = array<i64: 1>, scalar_prefetch = 0 : i64, scratch_operands = 0 : i64, tpu.core_type = #tpu.core_type<tc>, window_params = [{transform_indices = @transform_0, window_bounds = array<i64: 4, 512>}, {transform_indices = @transform_1, window_bounds = array<i64: 4, 512>}, {transform_indices = @transform_2, window_bounds = array<i64: 4, 512>}]} {
    %c0 = arith.constant 0 : index
    %c0_0 = arith.constant 0 : index
    %0 = vector.load %arg1[%c0, %c0_0] : memref<4x512xf32, #tpu.memory_space<vmem>>, vector<4x512xf32>
    %1 = arith.mulf %0, %0 : vector<4x512xf32>
    %2 = arith.mulf %1, %0 : vector<4x512xf32>
    %c0_1 = arith.constant 0 : index
    %c0_2 = arith.constant 0 : index
    %3 = vector.load %arg2[%c0_1, %c0_2] : memref<4x512xf32, #tpu.memory_space<vmem>>, vector<4x512xf32>
    tpu.vector_store %arg2[%c0_1, %c0_2], %2 {strides = array<i32>} : memref<4x512xf32, #tpu.memory_space<vmem>>, vector<4x512xf32>,
    %cst = arith.constant 3.000000e+00 : f32
    %4 = vector.broadcast %cst : f32 to vector<4x512xf32>
    %5 = arith.mulf %4, %1 : vector<4x512xf32>
    %c0_3 = arith.constant 0 : index
    %c0_4 = arith.constant 0 : index
    %6 = vector.load %arg3[%c0_3, %c0_4] : memref<4x512xf32, #tpu.memory_space<vmem>>, vector<4x512xf32>
    tpu.vector_store %arg3[%c0_3, %c0_4], %5 {strides = array<i32>} : memref<4x512xf32, #tpu.memory_space<vmem>>, vector<4x512xf32>,
    return
  }
  func.func @transform_0(%arg0: i32) -> (i32, i32) {
    %c0_i32 = arith.constant 0 : i32
    %c0_i32_0 = arith.constant 0 : i32
    return %arg0, %c0_i32 : i32, i32
  }
  func.func @transform_1(%arg0: i32) -> (i32, i32) {
    %c0_i32 = arith.constant 0 : i32
    %c0_i32_0 = arith.constant 0 : i32
    return %arg0, %c0_i32 : i32, i32
  }
  func.func @transform_2(%arg0: i32) -> (i32, i32) {
    %c0_i32 = arith.constant 0 : i32
    %c0_i32_0 = arith.constant 0 : i32
    return %arg0, %c0_i32 : i32, i32
  }
}

</mosaic_0001>

<bundles_post_ra>
// kernel: tpu_custom_call.1
= control target key start
LH: loop header
LB: loop body
LE: loop exit
PB: predicated region body
PF: predicated region fallthrough
CT: control target
= control target key end

     0   :  { %8 = vsyncpa [#allocation3], 0  ;;  %s201_s0 = inlined_call_operand.hbm [shape: f32[4,512], index: 0, kind: input, shape index: {}]   ;;  %s202_s1 = inlined_call_operand.hbm [shape: f32[4,512], index: 1, kind: output, shape index: {0}]   ;;  %s203_s2 = inlined_call_operand.hbm [shape: f32[4,512], index: 2, kind: output, shape index: {1}]  }
   0x1   :  { %9 = vsyncpa [#allocation4], 0 }
   0x2   :  { %10 = vsyncpa [#allocation7], 0  ;;  %s140_s9 = smov [#allocation2]   ;;  %s68_s13 = scalar_lea.hbm %s201_s0, 256 }
   0x3   :  { %s17_s10 = sshll.u32 %s140_s9, 4  ;;  %p69_p0 = scmp.ne.s32.totalorder %s201_s0, %s68_s13  ;;  %s18_s10 = int_to_ptr.vmem [resolvable:$true] %s17_s10 }
   0x4   :  { %p72_p1 = scmp.lt.u32.totalorder %s68_s13, %s201_s0 }
   0x6   :  { %p74_p2 = pnand %p72_p1, %p69_p0 }
   0x8   :  { %77 = shalt.err (!%p74_p2)
}
   0x9   :  { %s78_s18 = scalar_lea.vmem %s18_s10, 256  ;;  %p83_p4 = scmp.lt.s32.totalorder %s18_s10, %s18_s10 }
   0xa   :  { %p79_p3 = scmp.ne.s32.totalorder %s18_s10, %s78_s18  ;;  %p84_p5 = scmp.lt.s32.totalorder %s78_s18, %s78_s18 }
   0xc   :  { %p85_p6 = por %p84_p5, %p83_p4 }
   0xe   :  { %p86_p7 = pnand %p85_p6, %p79_p3 }
  0x10   :  { %89 = shalt.err (!%p86_p7)
}
  0x11   :  { %20 = dma.hbm_to_vmem [thread:$0]  %s201_s0, 256, %s18_s10, [#allocation3]  }
  0x12   :  { %134 = dma.done.wait [#allocation3], 256  }
  0x13   :  { %135 = vsyncadd [#allocation3], 4294967040  ;;  %v24_v0 = vld [vmem:[#allocation2] sm:$0xff]  ;;  %v25_v1 = vld [vmem:[#allocation2 + $0x8] sm:$0xff]  ;;  %s141_s21 = smov [#allocation5]   ;;  %s142_s23 = smov [#allocation6]  }
  0x14   :  { %s42_s22 = sshll.u32 %s141_s21, 4  ;;  %v26_v2 = vmul.f32 %v24_v0, %v24_v0  ;;  %v27_v3 = vmul.f32 %v25_v1, %v25_v1  ;;  %s52_s24 = sshll.u32 %s142_s23, 4  ;;  %s43_s22 = int_to_ptr.vmem [resolvable:$true] %s42_s22  ;;  %s170_s24 = int_to_ptr.vmem [resolvable:$true] %s52_s24 }
  0x15   :  { %s90_s0 = scalar_lea.vmem %s43_s22, 256  ;;  %p95_p9 = scmp.lt.s32.totalorder %s43_s22, %s43_s22 }
  0x16   :  { %v28_v4 = vmul.f32 %v26_v2, %v24_v0  ;;  %v29_v5 = vmul.f32 %v27_v3, %v25_v1  ;;  %v32_v6 = vmul.f32 3.0, %v26_v2  ;;  %v33_v7 = vmul.f32 3.0, %v27_v3  ;;  %p91_p8 = scmp.ne.s32.totalorder %s43_s22, %s90_s0  ;;  %p96_p10 = scmp.lt.s32.totalorder %s90_s0, %s90_s0 }
  0x18   :  { %30 = vst [vmem:[#allocation5] sm:$0xff] %v28_v4  ;;  %31 = vst [vmem:[#allocation5 + $0x8] sm:$0xff] %v29_v5  ;;  %p97_p11 = por %p96_p10, %p95_p9 }
  0x19   :  { %34 = vst [vmem:[#allocation6] sm:$0xff] %v32_v6  ;;  %35 = vst [vmem:[#allocation6 + $0x8] sm:$0xff] %v33_v7 }
  0x1a   :  { %p98_p12 = pnand %p97_p11, %p91_p8 }
  0x1c   :  { %101 = shalt.err (!%p98_p12)
}
  0x1d   :  { %s102_s27 = scalar_lea.hbm %s202_s1, 256 }
  0x1e   :  { %p103_p13 = scmp.ne.s32.totalorder %s202_s1, %s102_s27  ;;  %p106_p0 = scmp.lt.u32.totalorder %s102_s27, %s202_s1 }
  0x20   :  { %p108_p1 = pnand %p106_p0, %p103_p13 }
  0x22   :  { %111 = shalt.err (!%p108_p1)
}
  0x23   :  { %45 = dma.vmem_to_hbm [thread:$0]  %s43_s22, 256, %s202_s1, [#allocation4]  }
  0x24   :  { %s112_s6 = scalar_lea.vmem %s170_s24, 256  ;;  %p117_p3 = scmp.lt.s32.totalorder %s170_s24, %s170_s24 }
  0x25   :  { %p113_p2 = scmp.ne.s32.totalorder %s170_s24, %s112_s6  ;;  %p118_p4 = scmp.lt.s32.totalorder %s112_s6, %s112_s6 }
  0x27   :  { %p119_p5 = por %p118_p4, %p117_p3 }
  0x29   :  { %p120_p6 = pnand %p119_p5, %p113_p2 }
  0x2b   :  { %123 = shalt.err (!%p120_p6)
}
  0x2c   :  { %s124_s9 = scalar_lea.hbm %s203_s2, 256 }
  0x2d   :  { %p125_p7 = scmp.ne.s32.totalorder %s203_s2, %s124_s9  ;;  %p128_p8 = scmp.lt.u32.totalorder %s124_s9, %s203_s2 }
  0x2f   :  { %p130_p9 = pnand %p128_p8, %p125_p7 }
  0x31   :  { %133 = shalt.err (!%p130_p9)
}
  0x32   :  { %55 = dma.vmem_to_hbm [thread:$0]  %s170_s24, 256, %s203_s2, [#allocation7]  }
  0x33   :  { %136 = dma.done.wait [#allocation4], 256  }
  0x34   :  { %137 = vsyncadd [#allocation4], 4294967040 }
  0x35   :  { %138 = dma.done.wait [#allocation7], 256  }
  0x36   :  { %139 = vsyncadd [#allocation7], 4294967040 }
  0x37   :  { %62 = vsyncpa [#allocation3], 1 }
  0x38   :  { %63 = vsyncpa [#allocation4], 1 }
  0x39   :  { %64 = vsyncpa [#allocation7], 1 }

</bundles_post_ra>
